<compile_context>
chip_gen: v5e
topology: v5e:2x2
jax: 0.10.0
libtpu: 0.0.40
codegen_flags: <defaults>
</compile_context>

<pallas_src>
import functools

import numpy as np
import jax
import jax.numpy as jnp
from jax.experimental import pallas as pl
from jax.experimental.pallas import tpu as pltpu


_WORKING_SET_BUDGET = 24 * 1024 * 1024   # fits v7x 32 MiB scoped VMEM w/ headroom
_VMEM_LIMIT_BYTES = 32 * 1024 * 1024     # >= default on v6e/v7x, raises v5e's 16 MiB


def _round_up(v, m):
    return (v + m - 1) // m * m


def _padded_bytes(rows, cols, itemsize):
    """VMEM footprint of one (rows, cols) tile after (sublane, lane) padding."""
    sub = 8 * (4 // itemsize)            # f32 -> 8, bf16 -> 16, int8/fp8 -> 32
    return _round_up(rows, sub) * _round_up(cols, 128) * itemsize


def _build_avg_matrix(seq_len, kernel_size):
    """(L, L) f32 matrix implementing replicate-pad + AvgPool1d(k, stride=1)."""
    pad = (kernel_size - 1) // 2
    t = np.arange(seq_len)[:, None]
    src = np.clip(t + np.arange(kernel_size)[None, :] - pad, 0, seq_len - 1)  # (L, k)
    a = np.zeros((seq_len, seq_len), np.float32)
    np.add.at(a, (np.broadcast_to(t, src.shape), src), np.float32(1.0 / kernel_size))
    return jnp.asarray(a)


def _series_decomp_kernel(a_ref, x_ref, res_ref, mean_ref, *, row_tile):
    # a_ref:    (TL, L)  f32 row-block of the averaging matrix
    # x_ref:    (L, TN)  full-L, lane-dense column slab of the re-laid-out input
    # res_ref:  (TL, TN) x - moving_mean
    # mean_ref: (TL, TN) moving_mean
    i = pl.program_id(0)

    xf = x_ref[...].astype(jnp.float32)                      # (L, TN)
    mean = jnp.dot(a_ref[...], xf,
                   preferred_element_type=jnp.float32)       # MXU, (TL, TN)

    if row_tile == x_ref.shape[0]:
        x_rows = xf                                          # no L tiling
    else:
        r0 = i * row_tile
        if row_tile % 8 == 0:
            r0 = pl.multiple_of(r0, 8)
        x_rows = x_ref[pl.ds(r0, row_tile), :].astype(jnp.float32)

    mean_ref[...] = mean.astype(mean_ref.dtype)
    res_ref[...] = (x_rows - mean).astype(res_ref.dtype)


def _choose_tiles(L, N, itemsize):
    """Pick (row_tile, col_tile) from padded VMEM footprints, not nominal sizes."""
    # --- row tile (rows of A / output rows per grid step) ---
    if L <= 1024:
        tl = L
    else:
        tl = L
        for t in (1024, 512, 256, 128, 64, 32, 16, 8):
            if L % t == 0:
                tl = t
                break

    # --- column tile (lane-dense, multiple of 128 unless the problem is tiny) ---
    n_pad = _round_up(N, 128)
    a_bytes = 2 * _padded_bytes(tl, L, 4)                    # A f32, double-buffered
    budget = max(_WORKING_SET_BUDGET - a_bytes, 0)
    per_128 = (2 * _padded_bytes(L, 128, itemsize)           # x slab (full L), 2 bufs
               + 4 * _padded_bytes(tl, 128, itemsize))       # res + mean, 2 bufs each
    cols_128 = max(1, budget // max(per_128, 1))
    if N <= 128:
        tn = N
    else:
        tn = min(n_pad, cols_128 * 128)
        tn = max(128, (tn // 128) * 128)
        # keep >= 2 column blocks when N allows it so both v7x cores get work
        if tn >= n_pad and n_pad >= 256:
            tn = max(128, _round_up(n_pad // 2, 128))

    # if everything still collapsed to a single grid step, split the row axis
    if pl.cdiv(L, tl) * pl.cdiv(N, tn) == 1 and L >= 16 and L % 16 == 0:
        tl = L // 2
    return tl, tn


def series_decomp(x, kernel_size=25):
    """JAX/Pallas equivalent of the PyTorch series_decomp.forward.

    Args:
      x: (B, L, C) array (batch, time, channels).
      kernel_size: moving-average window (odd, as in the PyTorch module).
    Returns:
      (res, moving_mean), each (B, L, C).
    """
    assert kernel_size % 2 == 1, "series_decomp semantics assume odd kernel_size"
    B, L, C = x.shape
    N = B * C
    itemsize = jnp.dtype(x.dtype).itemsize

    a = _build_avg_matrix(L, kernel_size)                    # (L, L) f32
    # Lane-dense relayout: time on sublanes, batch*channel on lanes.
    x2 = jnp.transpose(x, (1, 0, 2)).reshape(L, N)

    tl, tn = _choose_tiles(L, N, itemsize)
    gl = pl.cdiv(L, tl)
    gn = pl.cdiv(N, tn)

    kern = functools.partial(_series_decomp_kernel, row_tile=tl)
    cost = pl.CostEstimate(
        flops=2 * L * L * N,
        transcendentals=0,
        bytes_accessed=3 * L * N * itemsize + L * L * 4,
    )

    res2, mean2 = pl.pallas_call(
        kern,
        out_shape=(
            jax.ShapeDtypeStruct((L, N), x.dtype),
            jax.ShapeDtypeStruct((L, N), x.dtype),
        ),
        grid_spec=pltpu.PrefetchScalarGridSpec(
            num_scalar_prefetch=0,
            grid=(gl, gn),
            in_specs=[
                # Row-block of A; constant along the inner (column) grid axis so
                # it is not re-fetched between consecutive steps.
                pl.BlockSpec((tl, L), lambda i, j: (i, 0)),
                # Full-L, lane-dense column slab of the input.
                pl.BlockSpec((L, tn), lambda i, j: (0, j)),
            ],
            out_specs=(
                pl.BlockSpec((tl, tn), lambda i, j: (i, j)),
                pl.BlockSpec((tl, tn), lambda i, j: (i, j)),
            ),
        ),
        compiler_params=pltpu.CompilerParams(
            dimension_semantics=("parallel", "parallel"),
            vmem_limit_bytes=_VMEM_LIMIT_BYTES,
        ),
        cost_estimate=cost,
    )(a, x2)

    res = jnp.transpose(res2.reshape(L, B, C), (1, 0, 2))
    mean = jnp.transpose(mean2.reshape(L, B, C), (1, 0, 2))
    return res, mean


def _series_decomp_ref(x, kernel_size=25):
    """Pure-JAX reference matching the PyTorch module exactly."""
    pad = (kernel_size - 1) // 2
    front = jnp.repeat(x[:, :1, :], pad, axis=1)
    end = jnp.repeat(x[:, -1:, :], pad, axis=1)
    xp = jnp.concatenate([front, x, end], axis=1)  # (B, L+2p, C)
    L = x.shape[1]
    windows = jnp.stack([xp[:, j:j + L, :] for j in range(kernel_size)], axis=0)
    mean = jnp.mean(windows, axis=0)
    return x - mean, mean


def _check(key, B, L, C, kernel_size):
    x = jax.random.normal(key, (B, L, C), dtype=jnp.float32)
    res, mean = series_decomp(x, kernel_size=kernel_size)
    res = jax.block_until_ready(res)
    mean = jax.block_until_ready(mean)
    res_ref, mean_ref = _series_decomp_ref(x, kernel_size=kernel_size)
    assert res.shape == (B, L, C) and mean.shape == (B, L, C)
    assert jnp.allclose(mean, mean_ref, atol=1e-5, rtol=1e-5)
    assert jnp.allclose(res, res_ref, atol=1e-5, rtol=1e-5)


if __name__ == "__main__":
    key = jax.random.PRNGKey(0)
    k0, k1, k2, k3 = jax.random.split(key, 4)

    # Module-default window, window longer than the sequence (pad-heavy case).
    _check(k0, B=2, L=16, C=8, kernel_size=25)
    # Interior banded case; exercises the row-split (two-step grid) path.
    _check(k1, B=4, L=48, C=8, kernel_size=9)
    # N = B*C = 128: fully lane-dense output tile.
    _check(k2, B=16, L=16, C=8, kernel_size=5)
    # N = 150 > 128: cdiv column grid with a masked tail block.
    _check(k3, B=3, L=24, C=50, kernel_size=7)

    print("KERNEL_OK")
</pallas_src>

<mosaic_0001>
module attributes {stable_mosaic.version = 11 : i64} {
  func.func @_series_decomp_kernel(%arg0: i32, %arg1: i32, %arg2: memref<8x16xf32, #tpu.memory_space<vmem>>, %arg3: memref<16x16xf32, #tpu.memory_space<vmem>>, %arg4: memref<8x16xf32, #tpu.memory_space<vmem>>, %arg5: memref<8x16xf32, #tpu.memory_space<vmem>>) attributes {dimension_semantics = [#tpu.dimension_semantics<parallel>, #tpu.dimension_semantics<parallel>], iteration_bounds = array<i64: 2, 1>, scalar_prefetch = 0 : i64, scratch_operands = 0 : i64, tpu.core_type = #tpu.core_type<tc>, window_params = [{transform_indices = @transform_0, window_bounds = array<i64: 8, 16>}, {transform_indices = @transform_1, window_bounds = array<i64: 16, 16>}, {transform_indices = @transform_2, window_bounds = array<i64: 8, 16>}, {transform_indices = @transform_3, window_bounds = array<i64: 8, 16>}]} {
    %c0 = arith.constant 0 : index
    %c0_0 = arith.constant 0 : index
    %0 = vector.load %arg3[%c0, %c0_0] : memref<16x16xf32, #tpu.memory_space<vmem>>, vector<16x16xf32>
    %c0_1 = arith.constant 0 : index
    %c0_2 = arith.constant 0 : index
    %1 = vector.load %arg2[%c0_1, %c0_2] : memref<8x16xf32, #tpu.memory_space<vmem>>, vector<8x16xf32>
    %cst = arith.constant dense<0.000000e+00> : vector<8x16xf32>
    %2 = tpu.matmul %1, %0, %cst {dimension_numbers = #tpu.dot_dimension_numbers<[1], [0], [0], [1], [0, 0, 1, 1], [], []>} : vector<8x16xf32>, vector<16x16xf32>, vector<8x16xf32> -> vector<8x16xf32>
    %c8_i32 = arith.constant 8 : i32
    %3 = arith.muli %arg0, %c8_i32 : i32
    %4 = tpu.assume_multiple %3, 8 : i32
    %5 = arith.index_cast %4 : i32 to index
    %c0_3 = arith.constant 0 : index
    %6 = vector.load %arg3[%5, %c0_3] : memref<16x16xf32, #tpu.memory_space<vmem>>, vector<8x16xf32>
    %c0_4 = arith.constant 0 : index
    %c0_5 = arith.constant 0 : index
    %7 = vector.load %arg5[%c0_4, %c0_5] : memref<8x16xf32, #tpu.memory_space<vmem>>, vector<8x16xf32>
    tpu.vector_store %arg5[%c0_4, %c0_5], %2 {strides = array<i32>} : memref<8x16xf32, #tpu.memory_space<vmem>>, vector<8x16xf32>,
    %8 = arith.subf %6, %2 : vector<8x16xf32>
    %c0_6 = arith.constant 0 : index
    %c0_7 = arith.constant 0 : index
    %9 = vector.load %arg4[%c0_6, %c0_7] : memref<8x16xf32, #tpu.memory_space<vmem>>, vector<8x16xf32>
    tpu.vector_store %arg4[%c0_6, %c0_7], %8 {strides = array<i32>} : memref<8x16xf32, #tpu.memory_space<vmem>>, vector<8x16xf32>,
    return
  }
  func.func @transform_0(%arg0: i32, %arg1: i32) -> (i32, i32) {
    %c0_i32 = arith.constant 0 : i32
    %c0_i32_0 = arith.constant 0 : i32
    return %arg0, %c0_i32 : i32, i32
  }
  func.func @transform_1(%arg0: i32, %arg1: i32) -> (i32, i32) {
    %c0_i32 = arith.constant 0 : i32
    %c0_i32_0 = arith.constant 0 : i32
    return %c0_i32, %arg1 : i32, i32
  }
  func.func @transform_2(%arg0: i32, %arg1: i32) -> (i32, i32) {
    %c0_i32 = arith.constant 0 : i32
    return %arg0, %arg1 : i32, i32
  }
  func.func @transform_3(%arg0: i32, %arg1: i32) -> (i32, i32) {
    %c0_i32 = arith.constant 0 : i32
    return %arg0, %arg1 : i32, i32
  }
}

</mosaic_0001>

<bundles_post_ra>
// kernel: tpu_custom_call.1
= control target key start
LH: loop header
LB: loop body
LE: loop exit
PB: predicated region body
PF: predicated region fallthrough
CT: control target
= control target key end

     0   :  { %9 = vsyncpa [#allocation3], 0  ;;  %s919_s0 = inlined_call_operand.hbm [shape: f32[16,16], index: 0, kind: input, shape index: {}]   ;;  %s920_s1 = inlined_call_operand.hbm [shape: f32[16,16], index: 1, kind: input, shape index: {}]   ;;  %s921_s2 = inlined_call_operand.hbm [shape: f32[16,16], index: 2, kind: output, shape index: {0}]   ;;  %s922_s3 = inlined_call_operand.hbm [shape: f32[16,16], index: 3, kind: output, shape index: {1}]  }
   0x1   :  { %11 = vsyncpa [#allocation3 + $0x1], 0 }
   0x2   :  { %12 = vsyncpa [#allocation6], 0 }
   0x3   :  { %13 = vsyncpa [#allocation4], 0 }
   0x4   :  { %15 = vsyncpa [#allocation4 + $0x1], 0 }
   0x5   :  { %16 = vsyncpa [#allocation9], 0 }
   0x6   :  { %18 = vsyncpa [#allocation9 + $0x1], 0  ;;  %s739_s12 = smov 0   ;;  %s741_s13 = smov 0  }
   0x7   :  { %s743_s14 = smov 0   ;;  %s745_s15 = smov 0  }
   0x8   :  { %s747_s16 = smov 0   ;;  %s749_s17 = smov 0  }
   0x9 LB: > { %s436_s18 = sadd.s32 4294967295, %s714_s17   ;;  %p438_p0 = scmp.ge.s32.totalorder %s714_s17, 1  ;;  %s714_s17 = sphi %s749_s17, %s24_s17   ;;  %s710_s16 = sphi %s747_s16, %s933_s16   ;;  %s706_s15 = sphi %s745_s15, %s932_s15   ;;  %s702_s14 = sphi %s743_s14, %s931_s14   ;;  %s698_s13 = sphi %s741_s13, %s930_s13   ;;  %s694_s12 = sphi %s739_s12, %s929_s12  }
   0xa   : > { %p771_p1 = scmp.eq.s32.totalorder %s436_s18, 0  ;;  %p149_p2 = scmp.lt.s32.totalorder %s714_s17, 3 }
   0xb   : > { %s162_s22 = sshll.u32 %s920_s1, 4  ;;  %s716_s24 = smov [#allocation5]   ;;  %s163_s22 = int_to_ptr.hbm [resolvable:$true] %s162_s22 }
   0xc   : > { %p779_p3 = pnand %p438_p0, %p149_p2  ;;  %s164_s25 = sshll.u32 %s716_s24, 4  ;;  %s165_s25 = int_to_ptr.vmem [resolvable:$true] %s164_s25 }
   0xd   : > { %p440_p6 = scmp.ge.s32.totalorder %s714_s17, 2  ;;  %s717_s26 = smov 128  }
   0xe   : > { %p466_p4 = pneg %p779_p3  ;;  %s718_s27 = smov 8  }
   0xf   : > { %s437_s28 = sadd.s32 4294967294, %s714_s17   ;;  %s36_s29 = sadd.s32 1, %s710_s16 }
  0x10   : > { %p467_p5 = pnand %p466_p4, %p771_p1  ;;  %s43_s30 = sadd.s32 1, %s702_s14 }
  0x11   : > { %p38_p7 = scmp.ge.s32.totalorder %s36_s29, 2  ;;  %p50_p8 = scmp.ne.s32.totalorder %s702_s14, %s698_s13 }
  0x12   : > { %469 = dma.hbm_to_vmem [thread:$0]  (!%p467_p5), %s163_s22, 256, %s165_s25, [#allocation6], %s717_s26, %s717_s26, %s718_s27  }
  0x13   : > { %p51_p9 = scmp.eq.s32.totalorder %s714_s17, 0  ;;  %p56_p10 = scmp.ne.s32.totalorder %s698_s13, %s694_s12 }
  0x14   : > { %s935_s29 = smov (%p38_p7, %s36_s29), 0  ;;  %p108_p13 = scmp.eq.s32.totalorder %s436_s18, 1 }
  0x15   : > { %p798_p11 = por %p51_p9, %p50_p8  ;;  %p804_p12 = por %p771_p1, %p56_p10 }
  0x16   : > { %s40_s6 = ssub.s32 %s710_s16, %s935_s29  ;;  %p114_p2 = scmp.eq.s32.totalorder %s437_s28, 1 }
  0x17   : > { %p41_p0 = scmp.eq.s32.totalorder %s40_s6, 0  ;;  %p810_p4 = por %p108_p13, %p50_p8 }
  0x18   : > { %p482_p5 = scmp.lt.s32.totalorder %s714_s17, 2  ;;  %p818_p7 = por %p114_p2, %p56_p10 }
  0x19   : > { %s816_s8 = scalar_select %p41_p0, %s702_s14, %s43_s30  }
  0x1a   : > { %s178_s10 = sand.u32 1, %s702_s14   ;;  %s442_s20 = sshll.u32 %s710_s16, 3 }
  0x1b   : > { %s441_s11 = sshll.u32 %s178_s10, 3  ;;  %s186_s18 = scalar_lea.hbm %s919_s0, %s442_s20 }
  0x1c   : > { %s182_s24 = scalar_lea.vmem [#allocation2], %s441_s11  ;;  %s188_s26 = sshll.u32 %s186_s18, 4  ;;  %s189_s26 = int_to_ptr.hbm [resolvable:$true] %s188_s26 }
  0x1d   : > { %s190_s25 = sshll.u32 %s182_s24, 4  ;;  %p471_p8 = pnand %p482_p5, %p798_p11  ;;  %s191_s25 = int_to_ptr.vmem [resolvable:$true] %s190_s25 }
  0x1e   : > { %s179_s27 = scalar_lea.sflag [#allocation3], %s178_s10  ;;  %199 = sbr.rel (%p779_p3) target bundleno = 183 (0xb7), region = 28 }
  0x1f   : > { %473 = dma.hbm_to_vmem [thread:$0]  (!%p471_p8), %s189_s26, 128, %s191_s25, %s179_s27  }
  0x20   : > { %s832_s28 = sand.u32 (!%p779_p3), 1, %s698_s13  }
  0x21   : > { %s835_s30 = sshll.u32 (!%p779_p3), %s832_s28, 3  ;;  %s202_s6 = scalar_lea.sflag (!%p779_p3), [#allocation3], %s832_s28 }
  0x22   : > { %s205_s11 = scalar_lea.vmem (!%p779_p3), [#allocation2], %s835_s30 }
  0x23   : > { %677 = dma.done.wait (%p804_p12), %s202_s6, 128  }
  0x24   : > { %679 = vsyncadd (%p804_p12), %s202_s6, 4294967168 }
  0x25   : > { %681 = dma.done.wait (%p771_p1), [#allocation6], 256  }
  0x26   : > { %683 = vsyncadd (%p771_p1), [#allocation6], 4294967040  ;;  %v240_v0 = vld [vmem:[#allocation5 + $0x8] sm:$0xff]  ;;  %v239_v1 = vld [vmem:[#allocation5] sm:$0xff]  ;;  %vm242_vm0 = vcmask 130048   ;;  %s449_s23 = sshll.u32 %s706_s15, 3 }
  0x27   : > { %260 = vmatpush.msra.mxu0 %v240_v0  ;;  %v241_v2 = vld [vmem:[%s205_s11] sm:$0xff]  ;;  %s304_s10 = scalar_lea.hbm %s922_s3, %s449_s23  ;;  %s289_s19 = scalar_lea.hbm %s921_s2, %s449_s23 }
  0x28   : > { %s238_s22 = scalar_lea.vmem [#allocation8], %s835_s30  ;;  %s308_s24 = sshll.u32 %s304_s10, 4  ;;  %s309_s24 = int_to_ptr.hbm [resolvable:$true] %s308_s24 }
  0x29   : > { %261 = vmatpush.msra.mxu0 %v239_v1  ;;  %s856_s18 = sshll.u32 %s238_s22, 4  ;;  %s231_s25 = scalar_lea.vmem [#allocation7], %s835_s30  ;;  %s307_s18 = int_to_ptr.vmem [resolvable:$true] %s856_s18 }
  0x2a   : > { %448 = vmatmul.msk.f32.vlgmr.msra.gmra.mxu0 %vm242_vm0, %v241_v2  ;;  %s859_s26 = sshll.u32 %s231_s25, 4  ;;  %s267_s15 = scalar_lea.vmem [#allocation5], %s449_s23  ;;  %s292_s26 = int_to_ptr.vmem [resolvable:$true] %s859_s26 }
  0x2b   : > { %v268_v3 = vld [vmem:[%s267_s15] sm:$0xff]  ;;  %s861_s27 = sshll.u32 %s289_s19, 4  ;;  %s278_s6 = scalar_lea.sflag [#allocation9], %s832_s28  ;;  %s294_s27 = int_to_ptr.hbm [resolvable:$true] %s861_s27 }
  0x2c   : > { %s610_s11 = sshra.s32 %s309_s24, 4  ;;  %s616_s5 = scalar_lea.hbm %s922_s3, 16  ;;  %s611_s11 = int_to_ptr.hbm [resolvable:$true] %s610_s11 }
  0x2d   : > { %s612_s30 = scalar_lea.hbm %s611_s11, 8  ;;  %p617_p10 = scmp.lt.s32.totalorder %s611_s11, %s922_s3 }
  0x2e   : > { %p613_p1 = scmp.ne.s32.totalorder %s611_s11, %s612_s30  ;;  %p618_p11 = scmp.lt.s32.totalorder %s616_s5, %s612_s30 }
  0x30   : > { %p614_p3 = pnand %p613_p1, %p810_p4  ;;  %p619_p12 = por %p618_p11, %p617_p10 }
  0x32   : > { %p615_p9 = pneg %p614_p3 }
  0x34   : > { %p620_p13 = pnand %p619_p12, %p615_p9 }
  0xa7   : > { %v263_v4 = vpop.f32.mrf.mxu0 }
  0xa8   : > { %269 = vst.msk [vmem:[%s238_s22] sm:$0xff] %vm242_vm0, %v263_v4  ;;  %v270_v5 = vsub.f32 %v268_v3, %v263_v4 }
  0xa9   : > { %623 = shalt.err (!%p620_p13)
}
  0xaa   : > { %463 = dma.vmem_to_hbm [thread:$0]  (%p810_p4), %s307_s18, 128, %s309_s24, %s278_s6   ;;  %271 = vst.msk [vmem:[%s231_s25] sm:$0xff] %vm242_vm0, %v270_v5 }
  0xab   : > { %s273_s21 = scalar_lea.sflag [#allocation4], %s832_s28  ;;  %s638_s19 = sshra.s32 %s294_s27, 4  ;;  %s639_s19 = int_to_ptr.hbm [resolvable:$true] %s638_s19 }
  0xac   : > { %s640_s22 = scalar_lea.hbm %s639_s19, 8  ;;  %s644_s30 = scalar_lea.hbm %s921_s2, 16 }
  0xad   : > { %p641_p0 = scmp.ne.s32.totalorder %s639_s19, %s640_s22  ;;  %p645_p8 = scmp.lt.s32.totalorder %s639_s19, %s921_s2 }
  0xae   : > { %p646_p1 = scmp.lt.s32.totalorder %s644_s30, %s640_s22 }
  0xaf   : > { %p642_p2 = pnand %p641_p0, %p810_p4 }
  0xb0   : > { %p647_p3 = por %p646_p1, %p645_p8 }
  0xb1   : > { %p643_p5 = pneg %p642_p2 }
  0xb3   : > { %p648_p9 = pnand %p647_p3, %p643_p5 }
  0xb5   : > { %651 = shalt.err (!%p648_p9)
}
  0xb6   : > { %462 = dma.vmem_to_hbm [thread:$0]  (%p810_p4), %s292_s26, 128, %s294_s27, %s273_s21  }
  0xb7 PF: > { %s320_s28 = sand.u32 1, %s694_s12   ;;  %p475_p10 = pnand %p440_p6, %p818_p7 }
  0xb8   : > { %s321_s18 = scalar_lea.sflag [#allocation4], %s320_s28 }
  0xb9   : > { %p476_p11 = pneg %p475_p10 }
  0xbb   : > { %685 = dma.done.wait (%p476_p11), %s321_s18, 128  }
  0xbc   : > { %687 = vsyncadd (%p476_p11), %s321_s18, 4294967168  ;;  %s331_s24 = scalar_lea.sflag [#allocation9], %s320_s28 }
  0xbd   : > { %689 = dma.done.wait (%p476_p11), %s331_s24, 128  }
  0xbe   : > { %691 = vsyncadd (%p476_p11), %s331_s24, 4294967168  ;;  %s24_s17 = sadd.s32 1, %s714_s17   ;;  %s929_s12 = smov %s698_s13 }
  0xbf   : > { %p21_p12 = scmp.ge.s32.totalorder %s24_s17, 4   ;;  %s930_s13 = smov %s702_s14 }
  0xc0   : > { %s931_s14 = smov %s816_s8  ;;  %s932_s15 = smov %s710_s16 }
  0xc1   : > { %s933_s16 = smov %s935_s29  ;;  %23 = sbr.rel (!%p21_p12) target bundleno = 9 (0x9), region = 96 }
  0xc6   :  { %337 = vsyncpa [#allocation3], 1 }
  0xc7   :  { %339 = vsyncpa [#allocation3 + $0x1], 1 }
  0xc8   :  { %340 = vsyncpa [#allocation6], 1 }
  0xc9   :  { %341 = vsyncpa [#allocation4], 1 }
  0xca   :  { %343 = vsyncpa [#allocation4 + $0x1], 1 }
  0xcb   :  { %344 = vsyncpa [#allocation9], 1 }
  0xcc   :  { %346 = vsyncpa [#allocation9 + $0x1], 1 }

</bundles_post_ra>
